<compile_context>
chip_gen: v7x
topology: tpu7x:2x2x1
jax: 0.10.0
libtpu: 0.0.40
codegen_flags: <defaults>
</compile_context>

<pallas_src>
import functools

import jax
import jax.numpy as jnp
from jax.experimental import pallas as pl
from jax.experimental.pallas import tpu as pltpu


def _make_logistic_loss_kernel(M, N, TM, TN, transpose_in_kernel):
    """Builds the kernel with static shape info baked in via closure."""
    fold_sublanes = (TM % 8 == 0) and (TM > 8)
    mask_i = (M % TM) != 0
    mask_j = (N % TN) != 0
    needs_mask = mask_i or mask_j

    def fold(v):
        # Fold the (TM, TN) tile down to (8, TN) with pure VPU adds so the
        # resident accumulator (the output block) is tiny.
        if fold_sublanes:
            v = v.reshape(TM // 8, 8, TN).sum(axis=0)
        return v

    def kernel(x_ref, t_ref, out_ref):
        i = pl.program_id(0)
        j = pl.program_id(1)

        # Each i's output block is resident across the whole j sweep; zero it
        # at the first j step.
        @pl.when(j == 0)
        def _():
            out_ref[...] = jnp.zeros_like(out_ref)

        x = x_ref[...].astype(jnp.float32)          # (TM, TN)
        t = t_ref[...].astype(jnp.float32)
        if transpose_in_kernel:
            # target tile arrives untransposed as (TN, TM); transpose on the
            # XLU (hidden under the HBM-bound pipeline).
            t = jnp.transpose(t)                     # (TM, TN)

        z = -(t * x)
        # Stable softplus == log(1 + exp(z)); avoids f32 overflow for large z.
        L = jnp.maximum(z, 0.0) + jnp.log(1.0 + jnp.exp(-jnp.abs(z)))

        if needs_mask:
            edge = None
            if mask_i:
                edge = i == pl.num_programs(0) - 1
            if mask_j:
                ej = j == pl.num_programs(1) - 1
                edge = ej if edge is None else (edge | ej)

            @pl.when(edge)
            def _():
                row = jax.lax.broadcasted_iota(jnp.int32, (TM, TN), 0) + i * TM
                col = jax.lax.broadcasted_iota(jnp.int32, (TM, TN), 1) + j * TN
                Lm = jnp.where((row < M) & (col < N), L, 0.0)
                out_ref[0] += fold(Lm)

            @pl.when(jnp.logical_not(edge))
            def _():
                out_ref[0] += fold(L)
        else:
            out_ref[0] += fold(L)

    return kernel


@functools.partial(jax.jit,
                   static_argnames=("max_tm", "max_tn", "vmem_limit_bytes"))
def logistic_loss(inputs: jax.Array, target: jax.Array,
                  *, max_tm: int = 512, max_tn: int = 1024,
                  vmem_limit_bytes: int = 32 * 1024 * 1024) -> jax.Array:
    """inputs: (M, N); target: (N, M) (same shape as inputs.T).

    Returns mean(log(1 + exp(-target * inputs.T))) as an f32 scalar.

    Inputs may be f32 or bf16; computation/accumulation is f32.  On v6e
    (128 MiB VMEM) callers may raise max_tm to 1024 and vmem_limit_bytes to
    64-96 MiB; defaults are sized for v7x's 64 MiB VMEM.
    """
    M, N = inputs.shape
    assert target.shape == (N, M), "target must have shape (N, M) = inputs.T shape"

    # Tile sizes: full dim if it fits in one block, otherwise a multiple of 128.
    TM = M if M <= max_tm else max_tm
    TN = N if N <= max_tn else max_tn
    grid_i = pl.cdiv(M, TM)
    grid_j = pl.cdiv(N, TN)

    # Per-i partial accumulator block: (8, TN) when TM folds over sublanes.
    acc_m = 8 if (TM % 8 == 0) else TM

    # Only do the in-kernel (XLU) transpose when both tile dims are 128-aligned
    # (guaranteed clean lowering, no layout surprises).  Otherwise the shapes
    # are small/unaligned and a single wrapper-side transpose is cheap.
    transpose_in_kernel = (TM % 128 == 0) and (TN % 128 == 0)
    if transpose_in_kernel:
        tgt = target                                   # (N, M), swapped index map
        t_spec = pl.BlockSpec((TN, TM), lambda i, j: (j, i))
    else:
        tgt = jnp.transpose(target)                    # (M, N), direct tiling
        t_spec = pl.BlockSpec((TM, TN), lambda i, j: (i, j))

    kernel = _make_logistic_loss_kernel(M, N, TM, TN, transpose_in_kernel)

    partials = pl.pallas_call(
        kernel,
        out_shape=jax.ShapeDtypeStruct((grid_i, acc_m, TN), jnp.float32),
        grid=(grid_i, grid_j),
        in_specs=[
            pl.BlockSpec((TM, TN), lambda i, j: (i, j)),   # inputs (M, N)
            t_spec,                                        # target
        ],
        out_specs=pl.BlockSpec((1, acc_m, TN), lambda i, j: (i, 0, 0)),
        compiler_params=pltpu.CompilerParams(
            dimension_semantics=("parallel", "arbitrary"),
            vmem_limit_bytes=vmem_limit_bytes,
        ),
    )(inputs, tgt)

    # Tiny epilogue: sum the per-i partial slabs and scale by 1/(M*N).
    return jnp.sum(partials) / float(M * N)


def _reference(inputs, target):
    return jnp.mean(jnp.log(1.0 + jnp.exp(-target * inputs.T)))


if __name__ == "__main__":
    key = jax.random.PRNGKey(0)

    # --- Small case (single block, wrapper-side transpose path) -------------
    k_in, k_tg = jax.random.split(key)
    M, N = 16, 8                      # inputs: (M, N); target: (N, M)
    inputs = jax.random.normal(k_in, (M, N), dtype=jnp.float32)
    target = jnp.where(
        jax.random.bernoulli(k_tg, 0.5, (N, M)), 1.0, -1.0
    ).astype(jnp.float32)

    loss = logistic_loss(inputs, target)
    jax.block_until_ready(loss)
    ref = _reference(inputs, target)
    assert jnp.allclose(loss, ref, rtol=1e-5, atol=1e-5), (loss, ref)

    # --- bf16 inputs (narrow-HBM path; kernel casts to f32 internally) ------
    inputs_bf = inputs.astype(jnp.bfloat16)
    target_bf = target.astype(jnp.bfloat16)
    loss_bf = logistic_loss(inputs_bf, target_bf)
    jax.block_until_ready(loss_bf)
    ref_bf = _reference(inputs_bf.astype(jnp.float32),
                        target_bf.astype(jnp.float32))
    assert jnp.allclose(loss_bf, ref_bf, rtol=1e-4, atol=1e-5), (loss_bf, ref_bf)

    # --- Tiled case (2x2 grid, parallel M axis, in-kernel transpose, masking) -
    k_in2, k_tg2 = jax.random.split(jax.random.PRNGKey(1))
    M2, N2 = 600, 1300                # forces 2x2 grid with partial tail tiles
    inputs2 = jax.random.normal(k_in2, (M2, N2), dtype=jnp.float32)
    target2 = jnp.where(
        jax.random.bernoulli(k_tg2, 0.5, (N2, M2)), 1.0, -1.0
    ).astype(jnp.float32)

    loss2 = logistic_loss(inputs2, target2)
    jax.block_until_ready(loss2)
    ref2 = _reference(inputs2, target2)
    assert jnp.allclose(loss2, ref2, rtol=1e-4, atol=1e-5), (loss2, ref2)

    print("KERNEL_OK")
</pallas_src>

<mosaic_0001>
module attributes {stable_mosaic.version = 11 : i64} {
  func.func @kernel(%arg0: i32, %arg1: i32, %arg2: memref<16x8xf32, #tpu.memory_space<vmem>>, %arg3: memref<16x8xf32, #tpu.memory_space<vmem>>, %arg4: memref<1x8x8xf32, #tpu.memory_space<vmem>>) attributes {dimension_semantics = [#tpu.dimension_semantics<parallel>, #tpu.dimension_semantics<arbitrary>], iteration_bounds = array<i64: 1, 1>, scalar_prefetch = 0 : i64, scratch_operands = 0 : i64, tpu.core_type = #tpu.core_type<tc>, window_params = [{transform_indices = @transform_0, window_bounds = array<i64: 16, 8>}, {transform_indices = @transform_1, window_bounds = array<i64: 16, 8>}, {transform_indices = @transform_2, window_bounds = array<i64: 1, 8, 8>}]} {
    %c0_i32 = arith.constant 0 : i32
    %0 = arith.cmpi eq, %arg1, %c0_i32 : i32
    %1 = arith.extui %0 : i1 to i32
    %c0_i32_0 = arith.constant 0 : i32
    %2 = arith.cmpi ne, %1, %c0_i32_0 : i32
    scf.if %2 {
      %cst_14 = arith.constant 0.000000e+00 : f32
      %26 = vector.broadcast %cst_14 : f32 to vector<1x8x8xf32>
      %c0_15 = arith.constant 0 : index
      %c0_16 = arith.constant 0 : index
      %c0_17 = arith.constant 0 : index
      %27 = vector.load %arg4[%c0_15, %c0_16, %c0_17] : memref<1x8x8xf32, #tpu.memory_space<vmem>>, vector<1x8x8xf32>
      tpu.vector_store %arg4[%c0_15, %c0_16, %c0_17], %26 {strides = array<i32>} : memref<1x8x8xf32, #tpu.memory_space<vmem>>, vector<1x8x8xf32>,
    } else {
    }
    %c0 = arith.constant 0 : index
    %c0_1 = arith.constant 0 : index
    %3 = vector.load %arg2[%c0, %c0_1] : memref<16x8xf32, #tpu.memory_space<vmem>>, vector<16x8xf32>
    %c0_2 = arith.constant 0 : index
    %c0_3 = arith.constant 0 : index
    %4 = vector.load %arg3[%c0_2, %c0_3] : memref<16x8xf32, #tpu.memory_space<vmem>>, vector<16x8xf32>
    %5 = arith.mulf %4, %3 : vector<16x8xf32>
    %cst = arith.constant 0.000000e+00 : f32
    %6 = vector.broadcast %cst : f32 to vector<16x8xf32>
    %7 = arith.subf %6, %5 : vector<16x8xf32>
    %cst_4 = arith.constant 0.000000e+00 : f32
    %8 = vector.broadcast %cst_4 : f32 to vector<16x8xf32>
    %9 = arith.maximumf %7, %8 : vector<16x8xf32>
    %10 = math.absf %7 : vector<16x8xf32>
    %cst_5 = arith.constant 0.000000e+00 : f32
    %11 = vector.broadcast %cst_5 : f32 to vector<16x8xf32>
    %12 = arith.subf %11, %10 : vector<16x8xf32>
    %13 = math.exp %12 : vector<16x8xf32>
    %cst_6 = arith.constant 1.000000e+00 : f32
    %14 = vector.broadcast %cst_6 : f32 to vector<16x8xf32>
    %15 = arith.addf %14, %13 : vector<16x8xf32>
    %16 = math.log %15 : vector<16x8xf32>
    %17 = arith.addf %9, %16 : vector<16x8xf32>
    %c0_7 = arith.constant 0 : index
    %c0_8 = arith.constant 0 : index
    %c0_9 = arith.constant 0 : index
    %18 = vector.load %arg4[%c0_7, %c0_8, %c0_9] : memref<1x8x8xf32, #tpu.memory_space<vmem>>, vector<1x8x8xf32>
    %19 = vector.shape_cast %18 : vector<1x8x8xf32> to vector<8x8xf32>
    %20 = vector.shape_cast %17 : vector<16x8xf32> to vector<2x8x8xf32>
    %cst_10 = arith.constant dense<0.000000e+00> : vector<8x8xf32>
    %21 = vector.multi_reduction <add>, %20, %cst_10 [0] : vector<2x8x8xf32> to vector<8x8xf32>
    %22 = arith.addf %19, %21 : vector<8x8xf32>
    %c0_11 = arith.constant 0 : index
    %c0_12 = arith.constant 0 : index
    %c0_13 = arith.constant 0 : index
    %23 = vector.load %arg4[%c0_11, %c0_12, %c0_13] : memref<1x8x8xf32, #tpu.memory_space<vmem>>, vector<1x8x8xf32>
    %24 = vector.shape_cast %23 : vector<1x8x8xf32> to vector<8x8xf32>
    %25 = vector.shape_cast %22 : vector<8x8xf32> to vector<1x8x8xf32>
    tpu.vector_store %arg4[%c0_11, %c0_12, %c0_13], %25 {strides = array<i32>} : memref<1x8x8xf32, #tpu.memory_space<vmem>>, vector<1x8x8xf32>,
    return
  }
  func.func @transform_0(%arg0: i32, %arg1: i32) -> (i32, i32) {
    %c0_i32 = arith.constant 0 : i32
    return %arg0, %arg1 : i32, i32
  }
  func.func @transform_1(%arg0: i32, %arg1: i32) -> (i32, i32) {
    %c0_i32 = arith.constant 0 : i32
    return %arg0, %arg1 : i32, i32
  }
  func.func @transform_2(%arg0: i32, %arg1: i32) -> (i32, i32, i32) {
    %c0_i32 = arith.constant 0 : i32
    %c0_i32_0 = arith.constant 0 : i32
    %c0_i32_1 = arith.constant 0 : i32
    return %arg0, %c0_i32, %c0_i32_0 : i32, i32, i32
  }
}

</mosaic_0001>

<bundles_post_ra>
// kernel: logistic_loss.1
= control target key start
LH: loop header
LB: loop body
LE: loop exit
PB: predicated region body
PF: predicated region fallthrough
CT: control target
= control target key end

     0   :  { %vm15_vm0 = vcmask 64512   ;;  %v63_v0 = vmov 0.0   ;;  %s104_s0 = inlined_call_operand.vmem [shape: f32[16,8], index: 0, kind: input, shape index: {}]   ;;  %s105_s1 = inlined_call_operand.vmem [shape: f32[16,8], index: 1, kind: input, shape index: {}]   ;;  %s106_s2 = inlined_call_operand.vmem [shape: f32[1,8,8], index: 2, kind: output, shape index: {}]  }
   0x1   :  { %16 = vst.msk [vmem:[%s106_s2] sm:$0xff] %vm15_vm0, %v63_v0  ;;  %v17_v1 = vld [vmem:[%s104_s0] sm:$0xff]  ;;  %v18_v2 = vld [vmem:[%s104_s0 + $0x8] sm:$0xff] }
   0x2   :  { %v19_v3 = vld [vmem:[%s105_s1] sm:$0xff]  ;;  %v20_v4 = vld [vmem:[%s105_s1 + $0x8] sm:$0xff] }
   0x3   :  { %v21_v5 = vmul.f32 %v19_v3, %v17_v1  ;;  %v22_v6 = vmul.f32 %v20_v4, %v18_v2 }
   0x5   :  { %v23_v7 = vsub.f32 0.0, %v21_v5  ;;  %v24_v8 = vsub.f32 0.0, %v22_v6 }
   0x7   :  { %v27_v9 = vand.u32 2147483647, %v23_v7  ;;  %v28_v10 = vand.u32 2147483647, %v24_v8  ;;  %v25_v19 = vmax.f32 %v23_v7, 0.0  ;;  %v26_v21 = vmax.f32 %v24_v8, 0.0 }
   0x8   :  { %v43_v28 = vld [vmem:[%s106_s2] sm:$0xff] }
   0x9   :  { %v29_v11 = vsub.f32 0.0, %v27_v9  ;;  %v30_v12 = vsub.f32 0.0, %v28_v10 }
   0xb   :  { %v31_v13 = vmul.f32 1.442695, %v29_v11  ;;  %v33_v14 = vmul.f32 1.442695, %v30_v12 }
   0xd   :  { %55 = vpow2.f32 %v31_v13 }
   0xe   :  { %57 = vpow2.f32 %v33_v14 }
  0x17   :  { %v56_v15 = vpop.eup %55 }
  0x18   :  { %v58_v16 = vpop.eup %57  ;;  %v35_v17 = vadd.f32 1.0, %v56_v15 }
  0x19   :  { %v36_v18 = vadd.f32 1.0, %v58_v16 }
  0x1a   :  { %59 = vlog2.f32 %v35_v17 }
  0x1b   :  { %61 = vlog2.f32 %v36_v18 }
  0x24   :  { %v60_v20 = vpop.eup %59 }
  0x25   :  { %v62_v22 = vpop.eup %61  ;;  %v38_v23 = vmul.f32 0.6931472, %v60_v20 }
  0x26   :  { %v40_v24 = vmul.f32 0.6931472, %v62_v22 }
  0x27   :  { %v41_v25 = vadd.f32 %v38_v23, %v25_v19 }
  0x28   :  { %v42_v26 = vadd.f32 %v40_v24, %v26_v21 }
  0x29   :  { %v45_v27 = vsel %vm15_vm0, %v41_v25, 0.0 }
  0x2a   :  { %v46_v29 = vsel %vm15_vm0, %v42_v26, 0.0 }
  0x2b   :  { %v47_v30 = vadd.f32 %v46_v29, %v45_v27 }
  0x2d   :  { %v48_v31 = vadd.f32 %v47_v30, %v43_v28 }
  0x2f   :  { %49 = vst.msk [vmem:[%s106_s2] sm:$0xff] %vm15_vm0, %v48_v31 }

</bundles_post_ra>
